<compile_context>
chip_gen: v5e
topology: v5e:2x2
jax: 0.10.0
libtpu: 0.0.40
codegen_flags: <defaults>
</compile_context>

<pallas_src>
import jax
import jax.numpy as jnp
import numpy as np
from jax.experimental import pallas as pl
from jax.experimental.pallas import tpu as pltpu

# ---- MultiBoxLoss.__init__ configuration (deterministic, in-script) --------
NUM_CLASSES = 8
OVERLAP_THRESH = 0.5
NEGPOS_RATIO = 3
VARIANCE = (0.1, 0.2)        # train_cfg['variance']
EPS = 1e-5

DET_Q_CHUNKS = 2             # v7x: 2 parallel Q chunks (no-op on 1-TC chips)
DICE_CHUNKS = 2              # v7x: 2 parallel row chunks (no-op on 1-TC chips)


def _round_up(x, m):
    return ((x + m - 1) // m) * m


def _cdiv(a, b):
    return -(-a // b)


# ===================== glue: SSD box matching (plain JAX) ====================
def _point_form(priors):
    return jnp.concatenate([priors[:, :2] - priors[:, 2:] / 2.0,
                            priors[:, :2] + priors[:, 2:] / 2.0], axis=1)


def _jaccard(box_a, box_b):
    max_xy = jnp.minimum(box_a[:, None, 2:], box_b[None, :, 2:])
    min_xy = jnp.maximum(box_a[:, None, :2], box_b[None, :, :2])
    inter = jnp.clip(max_xy - min_xy, 0.0, None).prod(-1)
    area_a = ((box_a[:, 2] - box_a[:, 0]) * (box_a[:, 3] - box_a[:, 1]))[:, None]
    area_b = ((box_b[:, 2] - box_b[:, 0]) * (box_b[:, 3] - box_b[:, 1]))[None, :]
    return inter / (area_a + area_b - inter)


def _match_one(truths, labels, priors):
    """truths [T,4] xyxy, labels [T], priors [P,4] cxcywh -> (loc [P,4], conf [P])."""
    T = truths.shape[0]
    overlaps = _jaccard(truths, _point_form(priors))            # [T, P]
    best_prior_idx = jnp.argmax(overlaps, axis=1)               # [T]
    best_truth_overlap = jnp.max(overlaps, axis=0)              # [P]
    best_truth_idx = jnp.argmax(overlaps, axis=0)               # [P]
    best_truth_overlap = best_truth_overlap.at[best_prior_idx].set(2.0)
    best_truth_idx = best_truth_idx.at[best_prior_idx].set(jnp.arange(T))
    matches = truths[best_truth_idx]                            # [P, 4]
    conf = (labels[best_truth_idx] + 1.0).astype(jnp.int32)
    conf = jnp.where(best_truth_overlap < OVERLAP_THRESH, 0, conf)
    g_cxcy = ((matches[:, :2] + matches[:, 2:]) / 2.0 - priors[:, :2]) \
        / (VARIANCE[0] * priors[:, 2:])
    g_wh = jnp.log((matches[:, 2:] - matches[:, :2]) / priors[:, 2:]) / VARIANCE[1]
    loc = jnp.concatenate([g_cxcy, g_wh], axis=1)
    return loc, conf


def _encode_targets(targets, priors):
    """targets [B, 4, T, 5] -> loc_t [B, P, 4, 4] f32, conf_t [B, P, 4] int32."""
    B, G, T, _ = targets.shape
    flat = targets.reshape(B * G, T, 5)
    locs, confs = jax.vmap(lambda t: _match_one(t[:, :4], t[:, 4], priors))(flat)
    loc_t = locs.reshape(B, G, -1, 4).transpose(0, 2, 1, 3)
    conf_t = confs.reshape(B, G, -1).transpose(0, 2, 1)
    return loc_t, conf_t


# =========================== Pallas TPU kernels ===============================
def _det_loss_kernel(loc_p_ref, loc_t_ref, aux_ref, out_ref, acc_ref):
    """Per-(batch, Q-chunk, Q-tile) detection loss partials.

    loc_p_ref (1, 4, tq) f32 : localization predictions (lane-major)
    loc_t_ref (1, 4, tq) f32 : encoded localization targets
    aux_ref   (1, 3, tq) f32 : sublane 0 = per-anchor CE, 1 = pos mask, 2 = neg mask
    out_ref   (1, 1, 1, 128) f32 : lanes 0..2 = (sum smooth-L1, sum selected CE, num_pos)
    acc_ref   SMEM (3,) f32  : running per-(batch, chunk) accumulators over Q tiles
                               (with whole-chunk tiles the Q-tile loop has ~1 step,
                                so this reduce runs ~once per batch/chunk).
    """
    q_idx = pl.program_id(2)

    @pl.when(q_idx == 0)
    def _init():
        acc_ref[0] = jnp.float32(0.0)
        acc_ref[1] = jnp.float32(0.0)
        acc_ref[2] = jnp.float32(0.0)

    lp = loc_p_ref[0]                        # (4, tq)
    lt = loc_t_ref[0]                        # (4, tq)
    aux = aux_ref[0]                         # (3, tq)
    ce = aux[0:1, :]                         # (1, tq)
    posf = aux[1:2, :]                       # (1, tq)
    negf = aux[2:3, :]                       # (1, tq)

    # ---- localization: smooth-L1 over positive anchors ----------------------
    d = lp - lt
    ad = jnp.abs(d)
    sl1 = jnp.where(ad < 1.0, 0.5 * d * d, ad - 0.5)          # (4, tq)

    # ---- classification: selected (pos | hard-neg) CE, precomputed in wrapper
    sel = jnp.maximum(posf, negf)                             # (1, tq)

    acc_ref[0] += jnp.sum(sl1 * posf)
    acc_ref[1] += jnp.sum(ce * sel)
    acc_ref[2] += jnp.sum(posf)

    @pl.when(q_idx == pl.num_programs(2) - 1)
    def _finalize():
        lane = jax.lax.broadcasted_iota(jnp.int32, (1, 1, 1, 128), 3)
        out_ref[...] = (jnp.where(lane == 0, acc_ref[0], 0.0)
                        + jnp.where(lane == 1, acc_ref[1], 0.0)
                        + jnp.where(lane == 2, acc_ref[2], 0.0))


def _dice_kernel(sp_ref, sg_ref, out_ref, acc_i_ref, acc_u_ref):
    """Streams [tr, 128] bf16 seg tiles, accumulating per-lane sum(p*g), sum(p+g).

    acc_i_ref / acc_u_ref : VMEM (1, 128) f32 per-lane partials (cross-lane XLU
    reduce only happens once in the final pl.when; per-tile work is VALU adds +
    a cheap sublane fold).
    """
    r = pl.program_id(1)

    @pl.when(r == 0)
    def _init():
        acc_i_ref[...] = jnp.zeros_like(acc_i_ref)
        acc_u_ref[...] = jnp.zeros_like(acc_u_ref)

    sp = sp_ref[...].astype(jnp.float32)     # cast right after load (v5e: no bf16 VPU)
    sg = sg_ref[...].astype(jnp.float32)
    acc_i_ref[...] += jnp.sum(sp * sg, axis=0, keepdims=True)
    acc_u_ref[...] += jnp.sum(sp + sg, axis=0, keepdims=True)

    @pl.when(r == pl.num_programs(1) - 1)
    def _finalize():
        inter = jnp.sum(acc_i_ref[...])
        union = jnp.sum(acc_u_ref[...])
        lane = jax.lax.broadcasted_iota(jnp.int32, (1, 1, 128), 2)
        out_ref[...] = (jnp.where(lane == 0, inter, 0.0)
                        + jnp.where(lane == 1, union, 0.0))


# ================================ wrapper =====================================
def multibox_loss(predictions, targets, segs, *, q_tile=65536, seg_row_tile=2048):
    """predictions = (loc_data [B,P,4,4], conf_data [B,P,4,C], priors [P,4],
    seg_data [M,1]); targets [B,4,T,5]; segs [B,H,W] (B*H*W == M)."""
    loc_data, conf_data, priors, seg_data = predictions
    B, P = loc_data.shape[0], loc_data.shape[1]
    priors = priors[:P, :]
    C = NUM_CLASSES
    Q = P * 4

    # ---- glue: SSD target matching (external `match` helper, plain JAX) -----
    loc_t, conf_t = _encode_targets(targets, priors)          # [B,P,4,4], [B,P,4]
    conf_t_q = conf_t.reshape(B, Q)
    pos = conf_t_q > 0
    posf = pos.astype(jnp.float32)

    # ---- per-anchor CE (computed once; reused for HNM rank AND the kernel) --
    conf_bqc = conf_data.reshape(B, Q, C).astype(jnp.float32)
    lse_g = jax.scipy.special.logsumexp(conf_bqc, axis=-1)
    gath_g = jnp.take_along_axis(conf_bqc, conf_t_q[..., None], axis=-1)[..., 0]
    ce_full = lse_g - gath_g                                  # [B, Q]

    # ---- glue: hard-negative-mining (ONE stable sort + scatter for ranks) ---
    lc = jnp.where(pos, 0.0, ce_full)
    loss_idx = jnp.argsort(-lc, axis=1)                       # stable descending
    rank_vals = jnp.broadcast_to(jnp.arange(Q, dtype=jnp.int32)[None, :], (B, Q))
    idx_rank = jnp.zeros((B, Q), jnp.int32).at[
        jnp.arange(B, dtype=jnp.int32)[:, None], loss_idx].set(rank_vals)
    num_pos = jnp.sum(pos, axis=1, keepdims=True)
    num_neg = jnp.minimum(NEGPOS_RATIO * num_pos, Q - 1)
    negf = (idx_rank < num_neg).astype(jnp.float32)

    # ---- lane-major layouts (no concat; minimal / usually zero Q padding) ---
    lanes = _round_up(Q, 128) // 128
    lanes_per_chunk = _cdiv(lanes, DET_Q_CHUNKS)
    tq = min(_round_up(max(q_tile, 128), 128), lanes_per_chunk * 128)
    nq = _cdiv(lanes_per_chunk * 128, tq)                     # Q tiles per chunk
    Qp = nq * tq * DET_Q_CHUNKS
    padq = Qp - Q

    loc_p_l = loc_data.reshape(B, Q, 4).transpose(0, 2, 1).astype(jnp.float32)
    loc_t_l = loc_t.reshape(B, Q, 4).transpose(0, 2, 1).astype(jnp.float32)
    aux = jnp.stack([ce_full, posf, negf], axis=1)            # [B, 3, Q]
    if padq:
        pw = ((0, 0), (0, 0), (0, padq))
        loc_p_l = jnp.pad(loc_p_l, pw)
        loc_t_l = jnp.pad(loc_t_l, pw)
        aux = jnp.pad(aux, pw)     # padded anchors: ce=0, pos=0, neg=0 -> no contribution

    det_bytes = 4 * (loc_p_l.size + loc_t_l.size + aux.size
                     + B * DET_Q_CHUNKS * 128)
    det = pl.pallas_call(
        _det_loss_kernel,
        out_shape=jax.ShapeDtypeStruct((B, DET_Q_CHUNKS, 1, 128), jnp.float32),
        grid_spec=pltpu.PrefetchScalarGridSpec(
            num_scalar_prefetch=0,
            grid=(B, DET_Q_CHUNKS, nq),
            in_specs=[
                pl.BlockSpec((1, 4, tq), lambda b, c, q: (b, 0, c * nq + q)),
                pl.BlockSpec((1, 4, tq), lambda b, c, q: (b, 0, c * nq + q)),
                pl.BlockSpec((1, 3, tq), lambda b, c, q: (b, 0, c * nq + q)),
            ],
            out_specs=pl.BlockSpec((1, 1, 1, 128), lambda b, c, q: (b, c, 0, 0)),
            scratch_shapes=[pltpu.SMEM((3,), jnp.float32)],
        ),
        compiler_params=pltpu.CompilerParams(
            dimension_semantics=("parallel", "parallel", "arbitrary"),
            vmem_limit_bytes=48 * 1024 * 1024,   # safe headroom even on v7x (64 MiB)
        ),
        cost_estimate=pl.CostEstimate(
            flops=int(B * Qp * 32),
            transcendentals=0,                    # CE precomputed in the wrapper
            bytes_accessed=int(det_bytes),
        ),
    )(loc_p_l, loc_t_l, aux)

    # N = total positives; like the PyTorch original there is no zero-guard.
    n = jnp.sum(det[:, :, 0, 2])
    loss_l = jnp.sum(det[:, :, 0, 0]) / n
    loss_c = jnp.sum(det[:, :, 0, 1]) / n

    # ---- segmentation dice loss: streamed bf16 row tiles ---------------------
    seg_gt = segs.reshape(-1, 1).astype(jnp.float32)          # view(-1, 1)
    sp, sg = jnp.broadcast_arrays(seg_data.astype(jnp.float32), seg_gt)
    sp = sp.reshape(-1).astype(jnp.bfloat16)                  # predictions: bf16 stream
    sg = sg.reshape(-1).astype(jnp.bfloat16)                  # 0/1 mask: exact in bf16
    pad_pix = (-sp.shape[0]) % 128
    if pad_pix:                                               # zeros don't change sums
        sp = jnp.pad(sp, (0, pad_pix))
        sg = jnp.pad(sg, (0, pad_pix))
    sp = sp.reshape(-1, 128)
    sg = sg.reshape(-1, 128)
    R = sp.shape[0]
    tr = min(seg_row_tile, _round_up(R, 16))
    tr = max(16, (tr // 16) * 16)                             # bf16 sublane packing
    nr = _cdiv(R, DICE_CHUNKS * tr)                           # row tiles per chunk
    Rp = nr * tr * DICE_CHUNKS
    if Rp > R:
        sp = jnp.pad(sp, ((0, Rp - R), (0, 0)))
        sg = jnp.pad(sg, ((0, Rp - R), (0, 0)))

    sums = pl.pallas_call(
        _dice_kernel,
        out_shape=jax.ShapeDtypeStruct((DICE_CHUNKS, 1, 128), jnp.float32),
        grid_spec=pltpu.PrefetchScalarGridSpec(
            num_scalar_prefetch=0,
            grid=(DICE_CHUNKS, nr),
            in_specs=[pl.BlockSpec((tr, 128), lambda c, r: (c * nr + r, 0)),
                      pl.BlockSpec((tr, 128), lambda c, r: (c * nr + r, 0))],
            out_specs=pl.BlockSpec((1, 1, 128), lambda c, r: (c, 0, 0)),
            scratch_shapes=[pltpu.VMEM((1, 128), jnp.float32),
                            pltpu.VMEM((1, 128), jnp.float32)],
        ),
        compiler_params=pltpu.CompilerParams(
            dimension_semantics=("parallel", "arbitrary"),
            vmem_limit_bytes=48 * 1024 * 1024,
        ),
        cost_estimate=pl.CostEstimate(
            flops=int(4 * Rp * 128),
            transcendentals=0,
            bytes_accessed=int(2 * 2 * Rp * 128 + 4 * DICE_CHUNKS * 128),
        ),
    )(sp, sg)
    inter = jnp.sum(sums[:, 0, 0])
    union = jnp.sum(sums[:, 0, 1]) + EPS
    loss_s = 1.0 - 2.0 * inter / union

    return loss_l, loss_c, loss_s


# ====================== pure-JAX reference (validation) ======================
def _reference(predictions, targets, segs):
    loc_data, conf_data, priors, seg_data = predictions
    B, P = loc_data.shape[0], loc_data.shape[1]
    priors = priors[:P, :]
    loc_t, conf_t = _encode_targets(targets, priors)
    Q = P * 4
    pos = conf_t.reshape(B, Q) > 0
    lp = loc_data.reshape(B, Q, 4)
    lt = loc_t.reshape(B, Q, 4)
    d = lp - lt
    ad = jnp.abs(d)
    sl1 = jnp.where(ad < 1.0, 0.5 * d * d, ad - 0.5)
    loss_l = jnp.sum(sl1 * pos[..., None])
    conf = conf_data.reshape(B, Q, NUM_CLASSES)
    lse = jax.scipy.special.logsumexp(conf, axis=-1)
    gathered = jnp.take_along_axis(conf, conf_t.reshape(B, Q, 1), axis=-1)[..., 0]
    ce = lse - gathered
    lc = jnp.where(pos, 0.0, ce)
    loss_idx = jnp.argsort(-lc, axis=1)        # stable descending
    idx_rank = jnp.argsort(loss_idx, axis=1)   # inverse permutation = rank
    num_pos = jnp.sum(pos, axis=1, keepdims=True)
    num_neg = jnp.minimum(NEGPOS_RATIO * num_pos, Q - 1)
    neg = idx_rank < num_neg
    sel = pos | neg
    loss_c = jnp.sum(jnp.where(sel, ce, 0.0))
    n = jnp.sum(num_pos).astype(jnp.float32)
    loss_l = loss_l / n
    loss_c = loss_c / n
    seg_gt = segs.reshape(-1, 1)
    inter = jnp.sum(seg_data * seg_gt)
    union = jnp.sum(seg_data + seg_gt) + EPS
    loss_s = 1.0 - 2.0 * inter / union
    return loss_l, loss_c, loss_s


if __name__ == "__main__":
    # Small shapes, sized so both kernels run multi-step grids on every axis:
    #   det : Q = 1024, q_tile=256 -> grid (B=2, chunks=2, q_tiles=2)
    #   dice: 2*64*64 px -> 64 rows, seg_row_tile=16 -> grid (chunks=2, tiles=2)
    B, P, C, T, H, W = 2, 256, NUM_CLASSES, 3, 64, 64
    key = jax.random.PRNGKey(0)
    ks = jax.random.split(key, 9)

    loc_data = 0.1 * jax.random.normal(ks[0], (B, P, 4, 4), jnp.float32)
    conf_data = jax.random.normal(ks[1], (B, P, 4, C), jnp.float32)
    cxcy = jax.random.uniform(ks[2], (P, 2), minval=0.2, maxval=0.8)
    wh = jax.random.uniform(ks[3], (P, 2), minval=0.1, maxval=0.3)
    priors = jnp.concatenate([cxcy, wh], axis=1).astype(jnp.float32)

    centers = jax.random.uniform(ks[4], (B, 4, T, 2), minval=0.3, maxval=0.7)
    sizes = jax.random.uniform(ks[5], (B, 4, T, 2), minval=0.1, maxval=0.3)
    boxes = jnp.concatenate([centers - sizes / 2.0, centers + sizes / 2.0], axis=-1)
    labels = jax.random.randint(ks[6], (B, 4, T, 1), 0, C - 1).astype(jnp.float32)
    targets = jnp.concatenate([boxes, labels], axis=-1)          # [B, 4, T, 5]

    seg_data = jax.random.uniform(ks[7], (B * H * W, 1), jnp.float32)
    segs = (jax.random.uniform(ks[8], (B, H, W)) > 0.5).astype(jnp.float32)

    predictions = (loc_data, conf_data, priors, seg_data)
    losses = multibox_loss(predictions, targets, segs, q_tile=256, seg_row_tile=16)
    losses = jax.block_until_ready(losses)

    ref = _reference(predictions, targets, segs)
    # Detection losses: f32 end-to-end -> tight tolerance.
    np.testing.assert_allclose(np.array(losses[:2], dtype=np.float32),
                               np.array(ref[:2], dtype=np.float32),
                               rtol=1e-4, atol=1e-5)
    # Dice loss: seg predictions are streamed in bf16 (f32 accumulation), so
    # allow for the bf16 rounding of the inputs vs. the full-f32 reference.
    np.testing.assert_allclose(np.float32(losses[2]), np.float32(ref[2]),
                               rtol=2e-3, atol=2e-4)
    print("KERNEL_OK")
</pallas_src>

<mosaic_0001>
module attributes {stable_mosaic.version = 11 : i64} {
  func.func @_det_loss_kernel(%arg0: i32, %arg1: i32, %arg2: i32, %arg3: memref<1x4x256xf32, #tpu.memory_space<vmem>>, %arg4: memref<1x4x256xf32, #tpu.memory_space<vmem>>, %arg5: memref<1x3x256xf32, #tpu.memory_space<vmem>>, %arg6: memref<1x1x1x128xf32, #tpu.memory_space<vmem>>, %arg7: memref<3xf32, #tpu.memory_space<smem>>) attributes {dimension_semantics = [#tpu.dimension_semantics<parallel>, #tpu.dimension_semantics<parallel>, #tpu.dimension_semantics<arbitrary>], iteration_bounds = array<i64: 2, 2, 2>, scalar_prefetch = 0 : i64, scratch_operands = 1 : i64, tpu.core_type = #tpu.core_type<tc>, window_params = [{transform_indices = @transform_0, window_bounds = array<i64: 1, 4, 256>}, {transform_indices = @transform_1, window_bounds = array<i64: 1, 4, 256>}, {transform_indices = @transform_2, window_bounds = array<i64: 1, 3, 256>}, {transform_indices = @transform_3, window_bounds = array<i64: 1, 1, 1, 128>}]} {
    %c0_i32 = arith.constant 0 : i32
    %0 = arith.cmpi eq, %arg2, %c0_i32 : i32
    %1 = arith.extui %0 : i1 to i32
    %c0_i32_0 = arith.constant 0 : i32
    %2 = arith.cmpi ne, %1, %c0_i32_0 : i32
    scf.if %2 {
      %cst_19 = arith.constant 0.000000e+00 : f32
      %c0_20 = arith.constant 0 : index
      %50 = memref.load %arg7[%c0_20] : memref<3xf32, #tpu.memory_space<smem>>
      memref.store %cst_19, %arg7[%c0_20] : memref<3xf32, #tpu.memory_space<smem>>
      %cst_21 = arith.constant 0.000000e+00 : f32
      %c1_22 = arith.constant 1 : index
      %51 = memref.load %arg7[%c1_22] : memref<3xf32, #tpu.memory_space<smem>>
      memref.store %cst_21, %arg7[%c1_22] : memref<3xf32, #tpu.memory_space<smem>>
      %cst_23 = arith.constant 0.000000e+00 : f32
      %c2_24 = arith.constant 2 : index
      %52 = memref.load %arg7[%c2_24] : memref<3xf32, #tpu.memory_space<smem>>
      memref.store %cst_23, %arg7[%c2_24] : memref<3xf32, #tpu.memory_space<smem>>
    } else {
    }
    %c0 = arith.constant 0 : index
    %c0_1 = arith.constant 0 : index
    %c0_2 = arith.constant 0 : index
    %3 = vector.load %arg3[%c0, %c0_1, %c0_2] : memref<1x4x256xf32, #tpu.memory_space<vmem>>, vector<1x4x256xf32>
    %4 = vector.shape_cast %3 : vector<1x4x256xf32> to vector<4x256xf32>
    %c0_3 = arith.constant 0 : index
    %c0_4 = arith.constant 0 : index
    %c0_5 = arith.constant 0 : index
    %5 = vector.load %arg4[%c0_3, %c0_4, %c0_5] : memref<1x4x256xf32, #tpu.memory_space<vmem>>, vector<1x4x256xf32>
    %6 = vector.shape_cast %5 : vector<1x4x256xf32> to vector<4x256xf32>
    %c0_6 = arith.constant 0 : index
    %c0_7 = arith.constant 0 : index
    %c0_8 = arith.constant 0 : index
    %7 = vector.load %arg5[%c0_6, %c0_7, %c0_8] : memref<1x3x256xf32, #tpu.memory_space<vmem>>, vector<1x3x256xf32>
    %8 = vector.shape_cast %7 : vector<1x3x256xf32> to vector<3x256xf32>
    %9 = vector.extract_strided_slice %8 {offsets = [0, 0], sizes = [1, 256], strides = [1, 1]} : vector<3x256xf32> to vector<1x256xf32>
    %10 = vector.extract_strided_slice %8 {offsets = [1, 0], sizes = [1, 256], strides = [1, 1]} : vector<3x256xf32> to vector<1x256xf32>
    %11 = vector.extract_strided_slice %8 {offsets = [2, 0], sizes = [1, 256], strides = [1, 1]} : vector<3x256xf32> to vector<1x256xf32>
    %12 = arith.subf %4, %6 : vector<4x256xf32>
    %13 = math.absf %12 : vector<4x256xf32>
    %cst = arith.constant 1.000000e+00 : f32
    %14 = vector.broadcast %cst : f32 to vector<4x256xf32>
    %15 = arith.cmpf olt, %13, %14 : vector<4x256xf32>
    %cst_9 = arith.constant 5.000000e-01 : f32
    %16 = vector.broadcast %cst_9 : f32 to vector<4x256xf32>
    %17 = arith.mulf %16, %12 : vector<4x256xf32>
    %18 = arith.mulf %17, %12 : vector<4x256xf32>
    %cst_10 = arith.constant 5.000000e-01 : f32
    %19 = vector.broadcast %cst_10 : f32 to vector<4x256xf32>
    %20 = arith.subf %13, %19 : vector<4x256xf32>
    %21 = arith.select %15, %18, %20 : vector<4x256xi1>, vector<4x256xf32>
    %22 = arith.maximumf %10, %11 : vector<1x256xf32>
    %c0_11 = arith.constant 0 : index
    %23 = memref.load %arg7[%c0_11] : memref<3xf32, #tpu.memory_space<smem>>
    %24 = vector.broadcast %10 : vector<1x256xf32> to vector<4x256xf32>
    %25 = arith.mulf %21, %24 : vector<4x256xf32>
    %26 = vector.shape_cast %25 : vector<4x256xf32> to vector<1x4x256xf32>
    %cst_12 = arith.constant dense<0.000000e+00> : vector<1xf32>
    %27 = vector.multi_reduction <add>, %26, %cst_12 [1, 2] : vector<1x4x256xf32> to vector<1xf32>
    %28 = vector.shape_cast %27 : vector<1xf32> to vector<1x1x1xf32>
    %29 = vector.extract %28[0, 0, 0] : f32 from vector<1x1x1xf32>
    %30 = arith.addf %23, %29 : f32
    %c0_13 = arith.constant 0 : index
    %31 = memref.load %arg7[%c0_13] : memref<3xf32, #tpu.memory_space<smem>>
    memref.store %30, %arg7[%c0_13] : memref<3xf32, #tpu.memory_space<smem>>
    %c1 = arith.constant 1 : index
    %32 = memref.load %arg7[%c1] : memref<3xf32, #tpu.memory_space<smem>>
    %33 = arith.mulf %9, %22 : vector<1x256xf32>
    %34 = vector.shape_cast %33 : vector<1x256xf32> to vector<1x1x256xf32>
    %cst_14 = arith.constant dense<0.000000e+00> : vector<1xf32>
    %35 = vector.multi_reduction <add>, %34, %cst_14 [1, 2] : vector<1x1x256xf32> to vector<1xf32>
    %36 = vector.shape_cast %35 : vector<1xf32> to vector<1x1x1xf32>
    %37 = vector.extract %36[0, 0, 0] : f32 from vector<1x1x1xf32>
    %38 = arith.addf %32, %37 : f32
    %c1_15 = arith.constant 1 : index
    %39 = memref.load %arg7[%c1_15] : memref<3xf32, #tpu.memory_space<smem>>
    memref.store %38, %arg7[%c1_15] : memref<3xf32, #tpu.memory_space<smem>>
    %c2 = arith.constant 2 : index
    %40 = memref.load %arg7[%c2] : memref<3xf32, #tpu.memory_space<smem>>
    %41 = vector.shape_cast %10 : vector<1x256xf32> to vector<1x1x256xf32>
    %cst_16 = arith.constant dense<0.000000e+00> : vector<1xf32>
    %42 = vector.multi_reduction <add>, %41, %cst_16 [1, 2] : vector<1x1x256xf32> to vector<1xf32>
    %43 = vector.shape_cast %42 : vector<1xf32> to vector<1x1x1xf32>
    %44 = vector.extract %43[0, 0, 0] : f32 from vector<1x1x1xf32>
    %45 = arith.addf %40, %44 : f32
    %c2_17 = arith.constant 2 : index
    %46 = memref.load %arg7[%c2_17] : memref<3xf32, #tpu.memory_space<smem>>
    memref.store %45, %arg7[%c2_17] : memref<3xf32, #tpu.memory_space<smem>>
    %c1_i32 = arith.constant 1 : i32
    %47 = arith.cmpi eq, %arg2, %c1_i32 : i32
    %48 = arith.extui %47 : i1 to i32
    %c0_i32_18 = arith.constant 0 : i32
    %49 = arith.cmpi ne, %48, %c0_i32_18 : i32
    scf.if %49 {
      %50 = tpu.iota {dimensions = array<i32: 3>} : vector<1x1x1x128xi32>
      %c0_i32_19 = arith.constant 0 : i32
      %51 = vector.broadcast %c0_i32_19 : i32 to vector<1x1x1x128xi32>
      %52 = arith.cmpi eq, %50, %51 : vector<1x1x1x128xi32>
      %c0_20 = arith.constant 0 : index
      %53 = memref.load %arg7[%c0_20] : memref<3xf32, #tpu.memory_space<smem>>
      %cst_21 = arith.constant 0.000000e+00 : f32
      %54 = vector.broadcast %53 : f32 to vector<1x1x1x128xf32>
      %55 = vector.broadcast %cst_21 : f32 to vector<1x1x1x128xf32>
      %56 = arith.select %52, %54, %55 : vector<1x1x1x128xi1>, vector<1x1x1x128xf32>
      %c1_i32_22 = arith.constant 1 : i32
      %57 = vector.broadcast %c1_i32_22 : i32 to vector<1x1x1x128xi32>
      %58 = arith.cmpi eq, %50, %57 : vector<1x1x1x128xi32>
      %c1_23 = arith.constant 1 : index
      %59 = memref.load %arg7[%c1_23] : memref<3xf32, #tpu.memory_space<smem>>
      %cst_24 = arith.constant 0.000000e+00 : f32
      %60 = vector.broadcast %59 : f32 to vector<1x1x1x128xf32>
      %61 = vector.broadcast %cst_24 : f32 to vector<1x1x1x128xf32>
      %62 = arith.select %58, %60, %61 : vector<1x1x1x128xi1>, vector<1x1x1x128xf32>
      %63 = arith.addf %56, %62 : vector<1x1x1x128xf32>
      %c2_i32 = arith.constant 2 : i32
      %64 = vector.broadcast %c2_i32 : i32 to vector<1x1x1x128xi32>
      %65 = arith.cmpi eq, %50, %64 : vector<1x1x1x128xi32>
      %c2_25 = arith.constant 2 : index
      %66 = memref.load %arg7[%c2_25] : memref<3xf32, #tpu.memory_space<smem>>
      %cst_26 = arith.constant 0.000000e+00 : f32
      %67 = vector.broadcast %66 : f32 to vector<1x1x1x128xf32>
      %68 = vector.broadcast %cst_26 : f32 to vector<1x1x1x128xf32>
      %69 = arith.select %65, %67, %68 : vector<1x1x1x128xi1>, vector<1x1x1x128xf32>
      %70 = arith.addf %63, %69 : vector<1x1x1x128xf32>
      %c0_27 = arith.constant 0 : index
      %c0_28 = arith.constant 0 : index
      %c0_29 = arith.constant 0 : index
      %c0_30 = arith.constant 0 : index
      %71 = vector.load %arg6[%c0_27, %c0_28, %c0_29, %c0_30] : memref<1x1x1x128xf32, #tpu.memory_space<vmem>>, vector<1x1x1x128xf32>
      tpu.vector_store %arg6[%c0_27, %c0_28, %c0_29, %c0_30], %70 {strides = array<i32>} : memref<1x1x1x128xf32, #tpu.memory_space<vmem>>, vector<1x1x1x128xf32>,
    } else {
    }
    return
  }
  func.func @transform_0(%arg0: i32, %arg1: i32, %arg2: i32) -> (i32, i32, i32) {
    %c2_i32 = arith.constant 2 : i32
    %0 = arith.muli %arg1, %c2_i32 : i32
    %1 = arith.addi %0, %arg2 : i32
    %c0_i32 = arith.constant 0 : i32
    %c0_i32_0 = arith.constant 0 : i32
    return %arg0, %c0_i32, %1 : i32, i32, i32
  }
  func.func @transform_1(%arg0: i32, %arg1: i32, %arg2: i32) -> (i32, i32, i32) {
    %c2_i32 = arith.constant 2 : i32
    %0 = arith.muli %arg1, %c2_i32 : i32
    %1 = arith.addi %0, %arg2 : i32
    %c0_i32 = arith.constant 0 : i32
    %c0_i32_0 = arith.constant 0 : i32
    return %arg0, %c0_i32, %1 : i32, i32, i32
  }
  func.func @transform_2(%arg0: i32, %arg1: i32, %arg2: i32) -> (i32, i32, i32) {
    %c2_i32 = arith.constant 2 : i32
    %0 = arith.muli %arg1, %c2_i32 : i32
    %1 = arith.addi %0, %arg2 : i32
    %c0_i32 = arith.constant 0 : i32
    %c0_i32_0 = arith.constant 0 : i32
    return %arg0, %c0_i32, %1 : i32, i32, i32
  }
  func.func @transform_3(%arg0: i32, %arg1: i32, %arg2: i32) -> (i32, i32, i32, i32) {
    %c0_i32 = arith.constant 0 : i32
    %c0_i32_0 = arith.constant 0 : i32
    %c0_i32_1 = arith.constant 0 : i32
    return %arg0, %arg1, %c0_i32, %c0_i32_0 : i32, i32, i32, i32
  }
}

</mosaic_0001>

<bundles_post_ra>
// kernel: tpu_custom_call.1
= control target key start
LH: loop header
LB: loop body
LE: loop exit
PB: predicated region body
PF: predicated region fallthrough
CT: control target
= control target key end

     0   :  { %8 = vsyncpa [#allocation4], 0  ;;  %s1177_s0 = inlined_call_operand.vmem [shape: f32[2,4,1024], index: 0, kind: input, shape index: {}]   ;;  %s1178_s1 = inlined_call_operand.hbm [shape: f32[2,4,1024], index: 1, kind: input, shape index: {}]   ;;  %s1179_s2 = inlined_call_operand.vmem [shape: f32[2,3,1024], index: 2, kind: input, shape index: {}]   ;;  %s1180_s3 = inlined_call_operand.hbm [shape: f32[2,2,1,128], index: 3, kind: output, shape index: {}]  }
   0x1   :  { %10 = vsyncpa [#allocation4 + $0x1], 0 }
   0x2   :  { %11 = vsyncpa [#allocation5], 0 }
   0x3   :  { %13 = vsyncpa [#allocation5 + $0x1], 0  ;;  %s945_s12 = smov 0   ;;  %s947_s13 = smov 0  }
   0x4   :  { %s949_s14 = smov 0   ;;  %s951_s15 = smov 0  }
   0x5   :  { %s953_s16 = smov 0   ;;  %s955_s17 = smov 0  }
   0x6   :  { %s957_s18 = smov 0   ;;  %s959_s19 = smov 0  }
   0x7   :  { %s961_s20 = smov 0   ;;  %s963_s21 = smov 0  }
   0x8   :  { %s965_s22 = smov 0   ;;  %s967_s23 = smov 0  }
   0x9   :  { %s969_s24 = smov 0  }
   0xa LB: > { %1188 = sst [smem:[#allocation9_spill]] %s882_s14  ;;  %s1181_s25 = sadd.s32 4294967295, %s922_s24   ;;  %s922_s24 = sphi %s969_s24, %s19_s24   ;;  %s918_s23 = sphi %s967_s23, %s1217_s23   ;;  %s914_s22 = sphi %s965_s22, %s1209_s22   ;;  %s910_s21 = sphi %s963_s21, %s1208_s21   ;;  %s906_s20 = sphi %s961_s20, %s1216_s20   ;;  %s902_s19 = sphi %s959_s19, %s1207_s19   ;;  %s898_s18 = sphi %s957_s18, %s1206_s18   ;;  %s894_s17 = sphi %s955_s17, %s1215_s17   ;;  %s890_s16 = sphi %s953_s16, %s1214_s16   ;;  %s886_s15 = sphi %s951_s15, %s1213_s15   ;;  %s882_s14 = sphi %s949_s14, %s1204_s14   ;;  %s878_s13 = sphi %s947_s13, %s1212_s13   ;;  %s874_s12 = sphi %s945_s12, %s1211_s12  }
   0xb   : > { %1189 = sst [smem:[#allocation10_spill]] %s910_s21  ;;  %s31_s27 = sadd.s32 1, %s910_s21 }
   0xc   : > { %1190 = sst [smem:[#allocation11_spill]] %s914_s22  ;;  %s34_s28 = sadd.s32 1, %s914_s22 }
   0xd   : > { %p32_p0 = scmp.ge.s32.totalorder %s31_s27, 2  ;;  %s38_s29 = sadd.s32 1, %s918_s23 }
   0xe   : > { %s591_s30 = sshll.u32 %s914_s22, 1  ;;  %s83_s4 = sadd.s32 1, %s894_s17 }
   0xf   : > { %s1219_s27 = smov (%p32_p0, %s31_s27), 0  ;;  %s1221_s28 = smov (!%p32_p0, %s34_s28), %s914_s22 }
  0x10   : > { %1191 = sst [smem:[#allocation12_spill]] %s1219_s27  ;;  %s1021_s5 = sadd.s32 %s910_s21, %s591_s30 }
  0x11   : > { %p90_p1 = scmp.ne.s32.totalorder %s894_s17, %s890_s16  ;;  %p36_p2 = scmp.ge.s32.totalorder %s1221_s28, 2 }
  0x12   : > { %p91_p3 = scmp.eq.s32.totalorder %s922_s24, 0  ;;  %p96_p4 = scmp.ne.s32.totalorder %s890_s16, %s886_s15 }
  0x13   : > { %p97_p5 = scmp.eq.s32.totalorder %s1181_s25, 0  ;;  %s1223_s28 = smov (%p36_p2, %s1221_s28), 0 }
  0x14   : > { %1192 = sst [smem:[#allocation13_spill]] %s1223_s28  ;;  %s1225_s29 = smov (!%p36_p2, %s38_s29), %s918_s23 }
  0x15   : > { %s592_s6 = sshll.u32 %s1223_s28, 1  ;;  %p1034_p6 = por %p91_p3, %p90_p1 }
  0x16   : > { %p40_p7 = scmp.ge.s32.totalorder %s1225_s29, 2  ;;  %s77_s8 = sadd.s32 %s592_s6, %s1219_s27 }
  0x17   : > { %s79_s9 = ssub.s32 %s1021_s5, %s77_s8  ;;  %p1040_p8 = por %p97_p5, %p96_p4 }
  0x18   : > { %s1227_s29 = smov (%p40_p7, %s1225_s29), 0  ;;  %s139_s11 = ssub.s32 %s914_s22, %s1223_s28 }
  0x19   : > { %1195 = sst [smem:[#allocation14_spill]] %s1227_s29  ;;  %s143_s15 = sadd.s32 1, %s882_s14 }
  0x1a   : > { %s78_s30 = ssub.s32 %s918_s23, %s1227_s29  ;;  %p153_p9 = scmp.ne.s32.totalorder %s882_s14, %s878_s13 }
  0x1b   : > { %s80_s26 = sor.u32 %s79_s9, %s78_s30  ;;  %s140_s25 = sor.u32 %s139_s11, %s78_s30 }
  0x1c   : > { %p81_p10 = scmp.eq.s32.totalorder %s80_s26, 0  ;;  %p141_p11 = scmp.eq.s32.totalorder %s140_s25, 0 }
  0x1d   : > { %s1196_s6 = sadd.s32 4294967295, %s922_s24   ;;  %p159_p13 = scmp.ne.s32.totalorder %s878_s13, %s874_s12 }
  0x1e   : > { %p154_p12 = scmp.eq.s32.totalorder %s1196_s6, 7  ;;  %s1200_s29 = sadd.s32 4294967294, %s922_s24  }
  0x1f   : > { %s1058_s8 = scalar_select %p81_p10, %s894_s17, %s83_s4  }
  0x20   : > { %s1061_s27 = scalar_select %p141_p11, %s882_s14, %s143_s15  }
  0x21   : > { %1197 = sst [smem:[#allocation15_spill]] %s1058_s8  ;;  %p1063_p0 = por %p154_p12, %p153_p9 }
  0x22   : > { %1198 = sst [smem:[#allocation16_spill]] %s1061_s27  ;;  %p160_p1 = scmp.eq.s32.totalorder %s1200_s29, 7 }
  0x23   : > { %p646_p2 = scmp.lt.s32.totalorder %s922_s24, 8  ;;  %s197_s25 = sand.u32 1, %s894_s17  }
  0x24   : > { %p1070_p3 = por %p160_p1, %p159_p13  ;;  %s597_s9 = sshll.u32 %s197_s25, 3 }
  0x25   : > { %s599_s11 = sshll.u32 %s1021_s5, 1  ;;  %s600_s4 = sshll.u32 %s918_s23, 3 }
  0x26   : > { %s201_s30 = scalar_lea.vmem [#allocation3], %s597_s9  ;;  %s208_s6 = sadd.s32 %s600_s4, %s599_s11 }
  0x27   : > { %s214_s15 = sshll.u32 %s201_s30, 4  ;;  %s601_s22 = sshll.u32 %s208_s6, 2  ;;  %s215_s15 = int_to_ptr.vmem [resolvable:$true] %s214_s15 }
  0x28   : > { %p639_p4 = pnand %p646_p2, %p1034_p6  ;;  %s210_s29 = scalar_lea.hbm %s1178_s1, %s601_s22 }
  0x29   : > { %p602_p5 = scmp.ge.s32.totalorder %s922_s24, 1  ;;  %s212_s27 = sshll.u32 %s210_s29, 4  ;;  %s213_s27 = int_to_ptr.hbm [resolvable:$true] %s212_s27 }
  0x2a   : > { %p236_p7 = scmp.lt.s32.totalorder %s922_s24, 9  ;;  %s198_s14 = scalar_lea.sflag [#allocation4], %s197_s25 }
  0x2b   : > { %641 = dma.hbm_to_vmem [thread:$0]  (!%p639_p4), %s213_s27, 128, %s215_s15, %s198_s14  }
  0x2c   : > { %p237_p9 = pnand %p602_p5, %p236_p7 }
  0x2d   : > { %s242_s5 = sand.u32 (!%p237_p9), 1, %s890_s16  }
  0x2e   : > { %240 = sbr.rel (%p237_p9) target bundleno = 303 (0x12f), region = 32  ;;  %s603_s9 = sshll.u32 (!%p237_p9), %s242_s5, 3 }
  0x2f   : > { %s243_s11 = scalar_lea.sflag (!%p237_p9), [#allocation4], %s242_s5  ;;  %s246_s4 = scalar_lea.vmem (!%p237_p9), [#allocation3], %s603_s9 }
  0x33   : > { %865 = dma.done.wait (%p1040_p8), %s243_s11, 128  }
  0x34   : > { %867 = vsyncadd (%p1040_p8), %s243_s11, 4294967168  ;;  %s604_s21 = sshll.u32 %s902_s19, 1  ;;  %p294_p6 = scmp.lt.s32.totalorder %s906_s20, 1  ;;  %v333_v0 = vld [vmem:[%s246_s4] sm:$0xff]  ;;  %vm393_vm0 = vcmask 1040384   ;;  %vm357_vm1 = vcmask 1043456  }
  0x35   : > { %s292_s14 = sadd.s32 %s898_s18, %s604_s21  ;;  %s289_s9 = sand.u32 1, %s878_s13  }
  0x36   : > { %s605_s22 = sshll.u32 %s292_s14, 1  ;;  %p647_p8 = scmp.eq.s32.totalorder %s898_s18, 0 }
  0x37   : > { %s295_s27 = scalar_select %p294_p6, %s906_s20, 1 }
  0x38   : > { %p296_p10 = scmp.lt.s32.totalorder %s605_s22, 7  ;;  %s924_s11 = smov 0.0  }
  0x39   : > { %s606_s7 = sshll.u32 %s295_s27, 3  ;;  %633 = sst [smem:[#allocation2]] (%p647_p8), %s924_s11 }
  0x3a   : > { %s1229_s22 = smov (!%p296_p10, %s605_s22), 7  ;;  %634 = sst [smem:[#allocation2 + $0x1]] (%p647_p8), %s924_s11 }
  0x3b   : > { %s299_s8 = sadd.s32 %s606_s7, %s1229_s22  ;;  %635 = sst [smem:[#allocation2 + $0x2]] (%p647_p8), %s924_s11 }
  0x3c   : > { %s607_s25 = sshll.u32 %s299_s8, 2  ;;  %s347_s4 = sld [smem:[#allocation2]] }
  0x3d   : > { %s301_s10 = scalar_lea.vmem %s1177_s0, %s607_s25  ;;  %s318_s5 = scalar_lea.vmem %s1179_s2, %s607_s25 }
  0x3e   : > { %v332_v1 = vld [vmem:[%s301_s10] sm:$0xff]  ;;  %s615_s14 = sld [smem:[#allocation2 + $0x1]]  ;;  %s290_s15 = scalar_lea.vmem [#allocation6], %s289_s9 }
  0x3f   : > { %v334_v2 = vld [vmem:[%s318_s5] sm:$0x77]  ;;  %v335_v3 = vsub.f32 %v332_v1, %v333_v0  ;;  %s617_s27 = sld [smem:[#allocation2 + $0x2]]  ;;  %p618_p11 = scmp.ne.s32.totalorder %s898_s18, 1 }
  0x40   : > { %v348_v4 = vperm.slane %v334_v2, 1  ;;  %v349_v5 = vperm.slane %v334_v2, 5  ;;  %v614_v6 = vrot.slane %v334_v2, 9 }
  0x41   : > { %v336_v7 = vand.u32 2147483647, %v335_v3  ;;  %v338_v8 = vmul.f32 0.5, %v335_v3 }
  0x42   : > { %v352_v9 = vperm.slane %v348_v4, 1  ;;  %v353_v10 = vperm.slane %v349_v5, 1  ;;  %v410_v11 = vsel %vm393_vm0, %v348_v4, 0.0  ;;  %v411_v12 = vsel %vm393_vm0, %v349_v5, 0.0 }
  0x43   : > { %vm337_vm2 = vcmp.lt.f32.partialorder %v336_v7, 1.0  ;;  %v339_v13 = vmul.f32 %v338_v8, %v335_v3  ;;  %v613_v14 = vadd.f32 -0.5, %v336_v7  ;;  %v412_v16 = vadd.f32 %v411_v12, %v410_v11 }
  0x44   : > { %v356_v15 = vrot.slane %v353_v10, 4  ;;  %v346_v17 = vmax.f32 %v334_v2, %v614_v6 }
  0x45   : > { %v341_v18 = vsel %vm337_vm2, %v339_v13, %v613_v14  ;;  %413 = vadd.xlane.f32.xlu1 %v412_v16 }
  0x46   : > { %v358_v19 = vsel %vm357_vm1, %v352_v9, %v356_v15  ;;  %v616_v21 = vrot.slane %v346_v17, 9 }
  0x47   : > { %v360_v20 = vmul.f32 %v358_v19, %v341_v18 }
  0x48   : > { %v387_v22 = vmul.f32 %v616_v21, %v334_v2 }
  0x49   : > { %362 = vst [vmem:[#allocation1] ss:$2 sm:$0xff] %v360_v20 }
  0x4a   : > { %v389_v27 = vperm.slane %v387_v22, 0  ;;  %v390_v28 = vperm.slane %v387_v22, 4 }
  0x4c   : > { %v394_v30 = vsel %vm393_vm0, %v389_v27, 0.0  ;;  %v395_v31 = vsel %vm393_vm0, %v390_v28, 0.0 }
  0x4d   : > { %v396_v32 = vadd.f32 %v395_v31, %v394_v30 }
  0x50   : > { %v363_v23 = vld.sshfl [vmem:[#allocation1] sm:$0xff pattern:$0x75316420]  ;;  %v364_v24 = vld.sshfl [vmem:[#allocation1 + $0x8] sm:$0xff pattern:$0x75316420] }
  0x51   : > { %v367_v25 = vsel %vm357_vm1, %v363_v23, 0.0  ;;  %v368_v26 = vsel %vm357_vm1, %v364_v24, 0.0 }
  0x52   : > { %v369_v29 = vadd.f32 %v368_v26, %v367_v25 }
  0x54   : > { %370 = vadd.xlane.f32.xlu0 %v369_v29 }
  0x5c   : > { %397 = vadd.xlane.f32.xlu0 %v396_v32 }
  0xb8   : > { %v414_v33 = vpop.xlane.xlu1 %413 }
  0xb9   : > { %v415_v35 = vrot.slane %v414_v33, 4 }
  0xbb   : > { %v416_v38 = vadd.f32 %v415_v35, %v414_v33 }
  0xbd   : > { %v417_v41 = vrot.slane %v416_v38, 2 }
  0xbf   : > { %v418_v47 = vadd.f32 %v417_v41, %v416_v38 }
  0xc1   : > { %v419_v50 = vrot.slane %v418_v47, 1 }
  0xc3   : > { %v420_v53 = vadd.f32 %v419_v50, %v418_v47 }
  0xc7   : > { %v371_v34 = vpop.xlane.xlu0 %370 }
  0xc8   : > { %v372_v36 = vrot.slane %v371_v34, 4 }
  0xca   : > { %v373_v37 = vadd.f32 %v372_v36, %v371_v34 }
  0xcc   : > { %v374_v39 = vrot.slane %v373_v37, 2 }
  0xce   : > { %v375_v40 = vadd.f32 %v374_v39, %v373_v37 }
  0xcf   : > { %v398_v42 = vpop.xlane.xlu0 %397 }
  0xd0   : > { %v399_v43 = vrot.slane %v398_v42, 4  ;;  %v376_v44 = vrot.slane %v375_v40, 1 }
  0xd2   : > { %v400_v45 = vadd.f32 %v399_v43, %v398_v42  ;;  %v377_v46 = vadd.f32 %v376_v44, %v375_v40 }
  0xd4   : > { %v401_v48 = vrot.slane %v400_v45, 2  ;;  %624 = vpush %v377_v46 }
  0xd6   : > { %v402_v49 = vadd.f32 %v401_v48, %v400_v45 }
  0xd8   : > { %v403_v51 = vrot.slane %v402_v49, 1 }
  0xda   : > { %v404_v52 = vadd.f32 %v403_v51, %v402_v49 }
  0xdc   : > { %626 = vpush %v404_v52 }
  0xdd   : > { %628 = vpush %v420_v53 }
 0x105   : > { %s625_s21 = spop %624 }
 0x106   : > { %s379_s22 = sadd.f32 %s625_s21, %s347_s4 }
 0x108   : > { %381 = sst [smem:[#allocation2]] %s379_s22 }
 0x109   : > { %s432_s10 = sld [smem:[#allocation2]] (!%p618_p11) }
 0x10d   : > { %s627_s7 = spop %626  ;;  %428 = sbr.rel (%p618_p11) target bundleno = 287 (0x11f), region = 44 }
 0x10e   : > { %s406_s8 = sadd.f32 %s627_s7, %s615_s14  ;;  %s629_s25 = spop %628 }
 0x10f   : > { %s422_s30 = sadd.f32 %s629_s25, %s617_s27 }
 0x110   : > { %408 = sst [smem:[#allocation2 + $0x1]] %s406_s8 }
 0x111   : > { %424 = sst [smem:[#allocation2 + $0x2]] %s422_s30 }
 0x112   : > { %v429_v54 = vlaneseq  ;;  %s619_s6 = sld [smem:[#allocation2 + $0x1]]  ;;  %v433_v56 = vstv %s432_s10 }
 0x113   : > { %s620_s29 = sld [smem:[#allocation2 + $0x2]] }
 0x114   : > { %v430_v55 = vand.u32 127, %v429_v54 }
 0x116   : > { %vm431_vm3 = vcmp.eq.s32.totalorder %v430_v55, 0  ;;  %vm435_vm4 = vcmp.eq.s32.totalorder %v430_v55, 1  ;;  %vm440_vm5 = vcmp.eq.s32.totalorder %v430_v55, 2 }
 0x117   : > { %v434_v57 = vsel %vm431_vm3, %v433_v56, 0.0 }
 0x118   : > { %v437_v58 = vstv %s619_s6 }
 0x119   : > { %v438_v59 = vsel %vm435_vm4, %v437_v58, 0.0  ;;  %v442_v60 = vstv %s620_s29 }
 0x11a   : > { %v439_v61 = vadd.f32 %v438_v59, %v434_v57  ;;  %v443_v62 = vsel %vm440_vm5, %v442_v60, 0.0 }
 0x11c   : > { %v444_v63 = vadd.f32 %v443_v62, %v439_v61 }
 0x11e   : > { %445 = vst [vmem:[%s290_s15] sm:$0x1] %v444_v63 }
 0x11f PF: > { %s621_s18 = sshll.u32 %s906_s20, 1  ;;  %s459_s11 = sshll.u32 %s290_s15, 4  ;;  %s460_s11 = int_to_ptr.vmem [resolvable:$true] %s459_s11 }
 0x120   : > { %s456_s5 = sadd.s32 %s902_s19, %s621_s18  ;;  %s447_s27 = scalar_lea.sflag [#allocation5], %s289_s9 }
 0x121   : > { %s457_s14 = scalar_lea.hbm %s1180_s3, %s456_s5  ;;  %s804_s19 = scalar_lea.hbm %s1180_s3, 4 }
 0x122   : > { %s461_s22 = sshll.u32 %s457_s14, 4  ;;  %s462_s22 = int_to_ptr.hbm [resolvable:$true] %s461_s22 }
 0x123   : > { %s798_s7 = sshra.s32 %s462_s22, 4  ;;  %s799_s7 = int_to_ptr.hbm [resolvable:$true] %s798_s7 }
 0x124   : > { %s800_s8 = scalar_lea.hbm %s799_s7, 1  ;;  %p805_p2 = scmp.lt.s32.totalorder %s799_s7, %s1180_s3 }
 0x125   : > { %p801_p12 = scmp.ne.s32.totalorder %s799_s7, %s800_s8  ;;  %p806_p4 = scmp.lt.s32.totalorder %s804_s19, %s800_s8 }
 0x127   : > { %p802_p13 = pnand %p801_p12, %p1063_p0  ;;  %p807_p5 = por %p806_p4, %p805_p2 }
 0x129   : > { %p803_p1 = pneg %p802_p13 }
 0x12b   : > { %p808_p7 = pnand %p807_p5, %p803_p1 }
 0x12d   : > { %811 = shalt.err (!%p808_p7)
}
 0x12e   : > { %636 = dma.vmem_to_hbm [thread:$0]  (%p1063_p0), %s460_s11, 16, %s462_s22, %s447_s27  }
 0x12f PF: > { %p648_p9 = scmp.ge.s32.totalorder %s922_s24, 2  ;;  %s473_s9 = sand.u32 1, %s874_s12  }
 0x130   : > { %s474_s10 = scalar_lea.sflag [#allocation5], %s473_s9 }
 0x131   : > { %p643_p6 = pnand %p648_p9, %p1070_p3 }
 0x133   : > { %p644_p10 = pneg %p643_p6 }
 0x135   : > { %869 = dma.done.wait (%p644_p10), %s474_s10, 16  }
 0x136   : > { %871 = vsyncadd (%p644_p10), %s474_s10, 4294967280  ;;  %s19_s24 = sadd.s32 1, %s922_s24   ;;  %s1203_s28 = sld [smem:[#allocation9_spill]] }
 0x137   : > { %p1133_p8 = scmp.ge.s32.totalorder %s19_s24, 10   ;;  %s1204_s14 = sld [smem:[#allocation16_spill]] }
 0x138   : > { %s1205_s29 = sld [smem:[#allocation15_spill]]  ;;  %s1211_s12 = smov %s878_s13 }
 0x139   : > { %s1206_s18 = sld [smem:[#allocation10_spill]]  ;;  %s1213_s15 = smov %s890_s16 }
 0x13a   : > { %s1207_s19 = sld [smem:[#allocation11_spill]]  ;;  %s1214_s16 = smov %s894_s17 }
 0x13b   : > { %s1208_s21 = sld [smem:[#allocation12_spill]]  ;;  %s1216_s20 = smov %s918_s23 }
 0x13c   : > { %s1209_s22 = sld [smem:[#allocation13_spill]]  ;;  %s1212_s13 = smov %s1203_s28 }
 0x13d   : > { %s1210_s26 = sld [smem:[#allocation14_spill]] }
 0x13e   : > { %s1215_s17 = smov %s1205_s29 }
 0x13f   :  { %18 = sbr.rel (!%p1133_p8) target bundleno = 10 (0xa), region = 97 }
 0x143   : > { %s1217_s23 = smov %s1210_s26 }
 0x144   :  { %479 = vsyncpa [#allocation4], 1 }
 0x145   :  { %481 = vsyncpa [#allocation4 + $0x1], 1 }
 0x146   :  { %482 = vsyncpa [#allocation5], 1 }
 0x147   :  { %484 = vsyncpa [#allocation5 + $0x1], 1 }

</bundles_post_ra>
